<compile_context>
chip_gen: v5e
topology: v5e:2x2
jax: 0.10.0
libtpu: 0.0.40
codegen_flags: <defaults>
</compile_context>

<pallas_src>
import functools

import jax
import jax.numpy as jnp
from jax import lax
from jax.experimental import pallas as pl
from jax.experimental.pallas import tpu as pltpu


def _default_vmem_limit_bytes():
    """~3/4 of physical VMEM, capped at 100 MiB (96 MiB v5e/v6e, 48 MiB v7x)."""
    try:
        cap = getattr(pltpu.get_tpu_info(), "vmem_capacity_bytes", None)
        if cap:
            return int(min(100 * 1024 * 1024, (int(cap) * 3) // 4))
    except Exception:
        pass
    return 48 * 1024 * 1024   # safe fallback everywhere (v7x physical = 64 MiB)


_VMEM_LIMIT_BYTES = _default_vmem_limit_bytes()


def _projection_head_kernel(x_ref, w1_ref, b1_ref, w2_ref, b2_ref, o_ref):
    # x_ref:  (tm, emb_dim)   f32   (cast to bf16 in VMEM below)
    # w1_ref: (emb_dim, hid)  bf16  (resident)   b1_ref: (1, hid)   f32
    # w2_ref: (hid, proj)     bf16  (resident)   b2_ref: (1, proj)  f32
    # o_ref:  (tm, proj)      f32 (or bf16)
    x_bf = x_ref[...].astype(jnp.bfloat16)       # VMEM-local cast, no HBM pass

    # Linear 1 (bf16 MXU operands, f32 accumulation) + bias + ReLU in f32.
    h = jnp.dot(x_bf, w1_ref[...], preferred_element_type=jnp.float32)
    h = jnp.maximum(h + b1_ref[...], 0.0)

    # Linear 2 (bf16 MXU operands, f32 accumulation) + bias in f32.
    y = jnp.dot(h.astype(jnp.bfloat16), w2_ref[...],
                preferred_element_type=jnp.float32)
    y = y + b2_ref[...]

    # F.normalize(y, dim=1): y / max(||y||, 1e-12) == y * rsqrt(max(sq, 1e-24)).
    # rsqrt runs on the EUP (its own VLIW slot), leaving the VPU free.
    sq = jnp.sum(y * y, axis=1, keepdims=True)
    inv = lax.rsqrt(jnp.maximum(sq, 1e-24))
    o_ref[...] = (y * inv).astype(o_ref.dtype)


def _choose_batch_tile(B, tm):
    """Batch tile: multiple of 16 sublanes; >=2 grid tiles when B allows
    (v7x shards the 'parallel' axis across its 2 TensorCores)."""
    if B <= 16:
        return 16
    half = ((pl.cdiv(B, 2) + 15) // 16) * 16     # round half-batch up to 16
    return max(16, min(tm, half))


@functools.partial(jax.jit, static_argnames=("tm", "out_dtype"))
def projection_head(x, w1, b1, w2, b2, *, tm=512, out_dtype=jnp.float32):
    """Fused Linear -> ReLU -> Linear -> row L2-normalize.

    x:  (B, emb_dim) f32 (cast to bf16 inside the kernel body).
    w1: (emb_dim, hidden), w2: (hidden, proj_dim) -- pre-transposed (in, out),
        ideally pre-cast to bf16 ONCE at init (no per-call casts here).
    b1: (1, hidden), b2: (1, proj_dim) f32.
    Returns (B, proj_dim) in out_dtype (f32 default; bf16 halves the store stream).
    """
    B, emb_dim = x.shape
    hidden = w1.shape[1]
    proj_dim = w2.shape[1]

    tm_eff = _choose_batch_tile(B, tm)
    grid = (pl.cdiv(B, tm_eff),)   # partial last block masked by Pallas; no jnp.pad

    flops = 2 * B * emb_dim * hidden + 2 * B * hidden * proj_dim
    bytes_accessed = (
        B * emb_dim * x.dtype.itemsize              # x (read as stored, f32)
        + emb_dim * hidden * w1.dtype.itemsize      # W1 (bf16 if pre-cast)
        + hidden * proj_dim * w2.dtype.itemsize     # W2
        + (hidden + proj_dim) * 4                   # biases (f32)
        + B * proj_dim * jnp.dtype(out_dtype).itemsize   # output
    )

    # TODO(synk): for emb_dim >= ~1024 on v7x, add an "arbitrary" K grid axis
    # (f32 VMEM accumulator + pl.when init/finalize) and single-buffer the
    # resident weight BlockSpecs (pipeline_mode=pl.Buffered(1)) to fit 64 MiB.

    out = pl.pallas_call(
        _projection_head_kernel,
        out_shape=jax.ShapeDtypeStruct((B, proj_dim), out_dtype),
        grid_spec=pltpu.PrefetchScalarGridSpec(
            num_scalar_prefetch=0,
            grid=grid,
            in_specs=[
                pl.BlockSpec((tm_eff, emb_dim), lambda i: (i, 0)),   # x tile
                pl.BlockSpec((emb_dim, hidden), lambda i: (0, 0)),   # W1 (resident)
                pl.BlockSpec((1, hidden), lambda i: (0, 0)),         # b1
                pl.BlockSpec((hidden, proj_dim), lambda i: (0, 0)),  # W2 (resident)
                pl.BlockSpec((1, proj_dim), lambda i: (0, 0)),       # b2
            ],
            out_specs=pl.BlockSpec((tm_eff, proj_dim), lambda i: (i, 0)),
        ),
        compiler_params=pltpu.CompilerParams(
            dimension_semantics=("parallel",),
            vmem_limit_bytes=_VMEM_LIMIT_BYTES,
        ),
        cost_estimate=pl.CostEstimate(
            flops=flops,
            transcendentals=B,               # one rsqrt per row
            bytes_accessed=bytes_accessed,
        ),
    )(x, w1, b1, w2, b2)
    return out


if __name__ == "__main__":
    emb_dim = 128
    proj_dim = 128
    hidden = emb_dim * 2
    batch = 24   # small; -> 2 grid tiles of 16 rows, masked partial last block

    key = jax.random.PRNGKey(0)
    kx, kw1, kb1, kw2, kb2 = jax.random.split(key, 5)

    # Deterministic parameter init (nn.Linear W is (out, in); stored here
    # pre-transposed as (in, out) so the kernel computes x @ W + b directly).
    x = jax.random.normal(kx, (batch, emb_dim), dtype=jnp.float32)
    w1 = jax.random.normal(kw1, (emb_dim, hidden), dtype=jnp.float32) * 0.05
    b1 = jax.random.normal(kb1, (1, hidden), dtype=jnp.float32) * 0.01
    w2 = jax.random.normal(kw2, (hidden, proj_dim), dtype=jnp.float32) * 0.05
    b2 = jax.random.normal(kb2, (1, proj_dim), dtype=jnp.float32) * 0.01

    # Pre-cast the weights to bf16 ONCE at init (not per forward call).
    w1_bf = w1.astype(jnp.bfloat16)
    w2_bf = w2.astype(jnp.bfloat16)

    out = projection_head(x, w1_bf, b1, w2_bf, b2)
    out = jax.block_until_ready(out)
    assert out.shape == (batch, proj_dim)
    assert bool(jnp.all(jnp.isfinite(out)))

    # Reference 1: same mixed-precision math (bf16 MXU operands, f32 accum).
    xb = x.astype(jnp.bfloat16)
    h_m = jnp.maximum(
        jnp.dot(xb, w1_bf, preferred_element_type=jnp.float32) + b1, 0.0)
    y_m = jnp.dot(h_m.astype(jnp.bfloat16), w2_bf,
                  preferred_element_type=jnp.float32) + b2
    ref_mixed = y_m * lax.rsqrt(
        jnp.maximum(jnp.sum(y_m * y_m, axis=1, keepdims=True), 1e-24))
    assert jnp.allclose(out, ref_mixed, atol=2e-3, rtol=2e-3)

    # Reference 2: full-f32 PyTorch semantics (looser tolerance for bf16 MXU).
    h32 = jnp.maximum(x @ w1 + b1, 0.0)
    y32 = h32 @ w2 + b2
    ref_f32 = y32 / jnp.maximum(
        jnp.linalg.norm(y32, axis=1, keepdims=True), 1e-12)
    assert jnp.allclose(out, ref_f32, atol=2e-2, rtol=2e-2)

    print("KERNEL_OK")
</pallas_src>

<mosaic_0001>
module attributes {stable_mosaic.version = 11 : i64} {
  func.func @_projection_head_kernel(%arg0: i32, %arg1: memref<16x128xf32, #tpu.memory_space<vmem>>, %arg2: memref<128x256xbf16, #tpu.memory_space<vmem>>, %arg3: memref<1x256xf32, #tpu.memory_space<vmem>>, %arg4: memref<256x128xbf16, #tpu.memory_space<vmem>>, %arg5: memref<1x128xf32, #tpu.memory_space<vmem>>, %arg6: memref<16x128xf32, #tpu.memory_space<vmem>>) attributes {dimension_semantics = [#tpu.dimension_semantics<parallel>], iteration_bounds = array<i64: 2>, scalar_prefetch = 0 : i64, scratch_operands = 0 : i64, tpu.core_type = #tpu.core_type<tc>, window_params = [{transform_indices = @transform_0, window_bounds = array<i64: 16, 128>}, {pipeline_mode = #tpu.pipeline_mode<synchronous>, transform_indices = @transform_1, window_bounds = array<i64: 128, 256>}, {pipeline_mode = #tpu.pipeline_mode<synchronous>, transform_indices = @transform_2, window_bounds = array<i64: 1, 256>}, {pipeline_mode = #tpu.pipeline_mode<synchronous>, transform_indices = @transform_3, window_bounds = array<i64: 256, 128>}, {pipeline_mode = #tpu.pipeline_mode<synchronous>, transform_indices = @transform_4, window_bounds = array<i64: 1, 128>}, {transform_indices = @transform_5, window_bounds = array<i64: 16, 128>}]} {
    %c0 = arith.constant 0 : index
    %c0_0 = arith.constant 0 : index
    %0 = vector.load %arg1[%c0, %c0_0] : memref<16x128xf32, #tpu.memory_space<vmem>>, vector<16x128xf32>
    %1 = arith.truncf %0 : vector<16x128xf32> to vector<16x128xbf16>
    %c0_1 = arith.constant 0 : index
    %c0_2 = arith.constant 0 : index
    %2 = vector.load %arg2[%c0_1, %c0_2] : memref<128x256xbf16, #tpu.memory_space<vmem>>, vector<128x256xbf16>
    %cst = arith.constant dense<0.000000e+00> : vector<16x256xf32>
    %3 = tpu.matmul %1, %2, %cst {dimension_numbers = #tpu.dot_dimension_numbers<[1], [0], [0], [1], [0, 0, 1, 1], [], []>} : vector<16x128xbf16>, vector<128x256xbf16>, vector<16x256xf32> -> vector<16x256xf32>
    %c0_3 = arith.constant 0 : index
    %c0_4 = arith.constant 0 : index
    %4 = vector.load %arg3[%c0_3, %c0_4] : memref<1x256xf32, #tpu.memory_space<vmem>>, vector<1x256xf32>
    %5 = vector.broadcast %4 : vector<1x256xf32> to vector<16x256xf32>
    %6 = arith.addf %3, %5 : vector<16x256xf32>
    %cst_5 = arith.constant 0.000000e+00 : f32
    %7 = vector.broadcast %cst_5 : f32 to vector<16x256xf32>
    %8 = arith.maximumf %6, %7 : vector<16x256xf32>
    %9 = arith.truncf %8 : vector<16x256xf32> to vector<16x256xbf16>
    %c0_6 = arith.constant 0 : index
    %c0_7 = arith.constant 0 : index
    %10 = vector.load %arg4[%c0_6, %c0_7] : memref<256x128xbf16, #tpu.memory_space<vmem>>, vector<256x128xbf16>
    %cst_8 = arith.constant dense<0.000000e+00> : vector<16x128xf32>
    %11 = tpu.matmul %9, %10, %cst_8 {dimension_numbers = #tpu.dot_dimension_numbers<[1], [0], [0], [1], [0, 0, 1, 1], [], []>} : vector<16x256xbf16>, vector<256x128xbf16>, vector<16x128xf32> -> vector<16x128xf32>
    %c0_9 = arith.constant 0 : index
    %c0_10 = arith.constant 0 : index
    %12 = vector.load %arg5[%c0_9, %c0_10] : memref<1x128xf32, #tpu.memory_space<vmem>>, vector<1x128xf32>
    %13 = vector.broadcast %12 : vector<1x128xf32> to vector<16x128xf32>
    %14 = arith.addf %11, %13 : vector<16x128xf32>
    %15 = arith.mulf %14, %14 : vector<16x128xf32>
    %cst_11 = arith.constant dense<0.000000e+00> : vector<16xf32>
    %16 = vector.multi_reduction <add>, %15, %cst_11 [1] : vector<16x128xf32> to vector<16xf32>
    %17 = vector.shape_cast %16 : vector<16xf32> to vector<16x1xf32>
    %cst_12 = arith.constant 1.000000e-24 : f32
    %18 = vector.broadcast %cst_12 : f32 to vector<16x1xf32>
    %19 = arith.maximumf %17, %18 : vector<16x1xf32>
    %20 = math.rsqrt %19 : vector<16x1xf32>
    %21 = vector.broadcast %20 : vector<16x1xf32> to vector<16x128xf32>
    %22 = arith.mulf %14, %21 : vector<16x128xf32>
    %c0_13 = arith.constant 0 : index
    %c0_14 = arith.constant 0 : index
    %23 = vector.load %arg6[%c0_13, %c0_14] : memref<16x128xf32, #tpu.memory_space<vmem>>, vector<16x128xf32>
    tpu.vector_store %arg6[%c0_13, %c0_14], %22 {strides = array<i32>} : memref<16x128xf32, #tpu.memory_space<vmem>>, vector<16x128xf32>,
    return
  }
  func.func @transform_0(%arg0: i32) -> (i32, i32) {
    %c0_i32 = arith.constant 0 : i32
    %c0_i32_0 = arith.constant 0 : i32
    return %arg0, %c0_i32 : i32, i32
  }
  func.func @transform_1(%arg0: i32) -> (i32, i32) {
    %c0_i32 = arith.constant 0 : i32
    %c0_i32_0 = arith.constant 0 : i32
    %c0_i32_1 = arith.constant 0 : i32
    return %c0_i32, %c0_i32_0 : i32, i32
  }
  func.func @transform_2(%arg0: i32) -> (i32, i32) {
    %c0_i32 = arith.constant 0 : i32
    %c0_i32_0 = arith.constant 0 : i32
    %c0_i32_1 = arith.constant 0 : i32
    return %c0_i32, %c0_i32_0 : i32, i32
  }
  func.func @transform_3(%arg0: i32) -> (i32, i32) {
    %c0_i32 = arith.constant 0 : i32
    %c0_i32_0 = arith.constant 0 : i32
    %c0_i32_1 = arith.constant 0 : i32
    return %c0_i32, %c0_i32_0 : i32, i32
  }
  func.func @transform_4(%arg0: i32) -> (i32, i32) {
    %c0_i32 = arith.constant 0 : i32
    %c0_i32_0 = arith.constant 0 : i32
    %c0_i32_1 = arith.constant 0 : i32
    return %c0_i32, %c0_i32_0 : i32, i32
  }
  func.func @transform_5(%arg0: i32) -> (i32, i32) {
    %c0_i32 = arith.constant 0 : i32
    %c0_i32_0 = arith.constant 0 : i32
    return %arg0, %c0_i32 : i32, i32
  }
}

</mosaic_0001>

<bundles_post_ra>
// kernel: projection_head.1
= control target key start
LH: loop header
LB: loop body
LE: loop exit
PB: predicated region body
PF: predicated region fallthrough
CT: control target
= control target key end

     0   :  { %s1527_s0 = inlined_call_operand.hbm [shape: f32[24,128], index: 0, kind: input, shape index: {}]   ;;  %s1528_s1 = inlined_call_operand.hbm [shape: bf16[128,256], index: 1, kind: input, shape index: {}]   ;;  %s1529_s2 = inlined_call_operand.hbm [shape: f32[1,256], index: 2, kind: input, shape index: {}]   ;;  %s1530_s3 = inlined_call_operand.hbm [shape: bf16[256,128], index: 3, kind: input, shape index: {}]   ;;  %s1531_s4 = inlined_call_operand.vmem [shape: f32[1,128], index: 4, kind: input, shape index: {}]   ;;  %s1532_s5 = inlined_call_operand.hbm [shape: f32[24,128], index: 5, kind: output, shape index: {}]  }
   0x1   :  { %1535 = sst [smem:[#allocation15_spill]] %s1528_s1 }
   0x2   :  { %1536 = sst [smem:[#allocation16_spill]] %s1529_s2 }
   0x3   :  { %10 = vsyncpa [#allocation3], 0 }
   0x4   :  { %12 = vsyncpa [#allocation3 + $0x1], 0 }
   0x5   :  { %13 = vsyncpa [#allocation6], 0 }
   0x6   :  { %14 = vsyncpa [#allocation9], 0 }
   0x7   :  { %15 = vsyncpa [#allocation4], 0 }
   0x8   :  { %17 = vsyncpa [#allocation4 + $0x1], 0  ;;  %s1298_s18 = smov 0   ;;  %s1300_s19 = smov 0  }
   0x9   :  { %s1302_s20 = smov 0   ;;  %s1304_s21 = smov 0  }
   0xa LB: > { %s1319_s22 = sadd.s32 4294967295, %s1253_s21   ;;  %s766_s23 = sadd.s32 4294967294, %s1253_s21   ;;  %s1253_s21 = sphi %s1304_s21, %s1556_s21   ;;  %s1249_s20 = sphi %s1302_s20, %s1555_s20   ;;  %s1245_s19 = sphi %s1300_s19, %s1554_s19   ;;  %s1241_s18 = sphi %s1298_s18, %s1553_s18  }
   0xb   : > { %s1323_s24 = sadd.s32 1, %s1253_s21   ;;  %s30_s25 = sadd.s32 1, %s1249_s20 }
   0xc   : > { %s27_s26 = ssub.s32 %s1253_s21, %s1323_s24  ;;  %p37_p0 = scmp.ne.s32.totalorder %s1249_s20, %s1245_s19 }
   0xd   : > { %p28_p1 = scmp.eq.s32.totalorder %s27_s26, 0  ;;  %p38_p2 = scmp.eq.s32.totalorder %s1253_s21, 0 }
   0xe   : > { %p43_p3 = scmp.ne.s32.totalorder %s1245_s19, %s1241_s18  ;;  %p1534_p4 = scmp.eq.s32.totalorder %s1319_s22, 0 }
   0xf   : > { %s1335_s27 = scalar_select %p28_p1, %s1249_s20, %s30_s25  }
  0x10   : > { %p1337_p5 = por %p38_p2, %p37_p0  ;;  %p1343_p6 = por %p1534_p4, %p43_p3 }
  0x11   : > { %p151_p7 = scmp.eq.s32.totalorder %s1319_s22, 1  ;;  %p157_p8 = scmp.eq.s32.totalorder %s766_s23, 1 }
  0x12   : > { %p767_p9 = scmp.ge.s32.totalorder %s1253_s21, 1  ;;  %p164_p10 = scmp.lt.s32.totalorder %s1253_s21, 3 }
  0x13   : > { %p1350_p11 = por %p151_p7, %p37_p0  ;;  %p1354_p12 = por %p157_p8, %p43_p3 }
  0x14   : > { %p1358_p13 = pnand %p767_p9, %p164_p10  ;;  %s1542_s1 = sld [smem:[#allocation15_spill]] }
  0x15   : > { %s1540_s6 = scalar_select %p1354_p12, 1, 0 }
  0x16   : > { %p970_p1 = pneg %p1358_p13  ;;  %s1255_s11 = smov [#allocation5]  }
  0x17   : > { %s177_s12 = sshll.u32 %s1255_s11, 4  ;;  %s1544_s2 = sld [smem:[#allocation16_spill]]  ;;  %s178_s12 = int_to_ptr.vmem [resolvable:$true] %s177_s12 }
  0x18   : > { %p1369_p0 = pnand %p970_p1, %p1534_p4  ;;  %s1256_s17 = smov 128  }
  0x19   : > { %s1257_s23 = smov 8   ;;  %s201_s8 = sshll.u32 %s1530_s3, 4  ;;  %s202_s8 = int_to_ptr.hbm [resolvable:$true] %s201_s8 }
  0x1a   : > { %s175_s10 = sshll.u32 %s1542_s1, 4  ;;  %s1258_s9 = smov [#allocation7]   ;;  %s176_s10 = int_to_ptr.hbm [resolvable:$true] %s175_s10 }
  0x1b   : > { %973 = dma.hbm_to_vmem [thread:$0]  (!%p1369_p0), %s176_s10, 2048, %s178_s12, [#allocation6], %s1256_s17, %s1256_s17, %s1257_s23  }
  0x1c   : > { %s192_s11 = sshll.u32 %s1258_s9, 4  ;;  %s1259_s14 = smov [#allocation8]   ;;  %s193_s11 = int_to_ptr.vmem [resolvable:$true] %s192_s11 }
  0x1d   : > { %s190_s16 = sshll.u32 %s1544_s2, 4  ;;  %s203_s15 = sshll.u32 %s1259_s14, 4  ;;  %s191_s16 = int_to_ptr.hbm [resolvable:$true] %s190_s16  ;;  %s204_s15 = int_to_ptr.vmem [resolvable:$true] %s203_s15 }
  0x1e   : > { %976 = dma.hbm_to_vmem [thread:$0]  (!%p1369_p0), %s191_s16, 32, %s193_s11, [#allocation6]  }
  0x1f   : > { %s1260_s1 = smov 64   ;;  %s1261_s2 = smov 4  }
  0x20   : > { %979 = dma.hbm_to_vmem [thread:$0]  (!%p1369_p0), %s202_s8, 2048, %s204_s15, [#allocation9], %s1260_s1, %s1260_s1, %s1261_s2  }
  0x21   : > { %p1533_p2 = scmp.ge.s32.totalorder %s1253_s21, 2 }
  0x23   : > { %216 = sbr.rel (%p1533_p2) target bundleno = 76 (0x4c), region = 32 }
  0x28   : > { %219 = sbr.rel (!%p1337_p5) target bundleno = 76 (0x4c), region = 36  ;;  %s220_s10 = sand.u32 (%p1337_p5), 1, %s1249_s20  }
  0x29   : > { %s773_s12 = sshll.u32 (%p1337_p5), %s1253_s21, 1  ;;  %s772_s16 = sshll.u32 (%p1337_p5), %s220_s10, 4 }
  0x2a   : > { %s226_s17 = ssub.s32 (%p1337_p5), 3, %s773_s12  ;;  %s1395_s23 = scalar_lea.sflag (%p1337_p5), [#allocation3], %s220_s10 }
  0x2b   : > { %p227_p3 = scmp.lt.s32.totalorder (%p1337_p5), %s226_s17, 2  ;;  %s224_s25 = scalar_lea.vmem (%p1337_p5), [#allocation2], %s772_s16 }
  0x2d   : > { %s1558_s17 = smov (!%p227_p3, %s226_s17), 2 }
  0x2e   : > { %s774_s13 = sshll.u32 %s1558_s17, 3 }
  0x2f   : > { %s230_s1 = ssub.s32 16, %s774_s13 }
  0x30   : > { %s231_s2 = sshll.u32 %s230_s1, 4 }
  0x31   : > { %232 = vsyncadd %s1395_s23, %s231_s2  ;;  %p1398_p5 = scmp.ne.s32.totalorder %s774_s13, 0  ;;  %s922_s26 = sshll.u32 %s1253_s21, 4 }
  0x32   : > { %s235_s11 = scalar_lea.hbm %s1527_s0, %s922_s26  ;;  %s1406_s14 = sshll.u32 %s224_s25, 4  ;;  %s240_s14 = int_to_ptr.vmem [resolvable:$true] %s1406_s14 }
  0x33   : > { %s237_s15 = sshll.u32 %s235_s11, 4  ;;  %s778_s10 = sshll.u32 %s1558_s17, 7  ;;  %s1409_s15 = int_to_ptr.hbm [resolvable:$true] %s237_s15 }
  0x34   : > { %s1129_s12 = sshra.s32 %s1409_s15, 4  ;;  %s1131_s16 = sshrl.u32 %s778_s10, 4  ;;  %s1130_s12 = int_to_ptr.hbm [resolvable:$true] %s1129_s12 }
  0x35   : > { %s1136_s13 = scalar_lea.hbm %s1130_s12, %s1131_s16  ;;  %s1140_s25 = scalar_lea.hbm %s1527_s0, 24 }
  0x36   : > { %p1137_p7 = scmp.ne.s32.totalorder %s1130_s12, %s1136_s13  ;;  %p1141_p10 = scmp.lt.s32.totalorder %s1130_s12, %s1527_s0 }
  0x37   : > { %p1142_p1 = scmp.lt.s32.totalorder %s1140_s25, %s1136_s13 }
  0x38   : > { %p1138_p8 = pnand %p1137_p7, %p1398_p5 }
  0x39   : > { %p1143_p0 = por %p1142_p1, %p1141_p10 }
  0x3a   : > { %p1139_p9 = pneg %p1138_p8 }
  0x3c   : > { %p1144_p3 = pnand %p1143_p0, %p1139_p9 }
  0x3e   : > { %1147 = shalt.err (!%p1144_p3)
}
  0x3f   : > { %s1148_s9 = sshra.s32 %s240_s14, 4  ;;  %s1262_s1 = smov [#allocation2]   ;;  %s1149_s9 = int_to_ptr.vmem [resolvable:$true] %s1148_s9 }
  0x40   : > { %s1155_s11 = scalar_lea.vmem %s1149_s9, %s1131_s16  ;;  %s1159_s2 = scalar_lea.vmem %s1262_s1, 32 }
  0x41   : > { %p1156_p7 = scmp.ne.s32.totalorder %s1149_s9, %s1155_s11  ;;  %p1161_p4 = scmp.lt.s32.totalorder %s1159_s2, %s1155_s11 }
  0x43   : > { %p1157_p8 = pnand %p1156_p7, %p1398_p5 }
  0x45   : > { %p1158_p2 = pneg %p1157_p8 }
  0x47   : > { %p1163_p12 = pnand %p1161_p4, %p1158_p2 }
  0x49   : > { %1166 = shalt.err (!%p1163_p12)
}
  0x4a   : > { %s1263_s12 = smov 128   ;;  %s1264_s13 = smov 8  }
  0x4b   : > { %245 = dma.hbm_to_vmem [thread:$0]  (%p1398_p5), %s1409_s15, %s778_s10, %s240_s14, %s1395_s23, %s1263_s12, %s1263_s12, %s1264_s13  }
  0x4c PF: > { %251 = sbr.rel (%p1358_p13) target bundleno = 578 (0x242), region = 40  ;;  %s1438_s16 = sand.u32 (!%p1358_p13), 1, %s1245_s19  }
  0x4d   : > { %s780_s25 = sshll.u32 (!%p1358_p13), %s1438_s16, 4  ;;  %s254_s26 = scalar_lea.sflag (!%p1358_p13), [#allocation3], %s1438_s16 }
  0x4e   : > { %s1444_s8 = scalar_lea.vmem (!%p1358_p13), [#allocation2], %s780_s25 }
  0x51   : > { %1224 = dma.done.wait (%p1343_p6), %s254_s26, 256  }
  0x52   : > { %1226 = vsyncadd (%p1343_p6), %s254_s26, 4294967040  ;;  %p1546_p4 = scmp.eq.s32.totalorder %s1319_s22, 0 }
  0x54   : > { %1228 = dma.done.wait (%p1546_p4), [#allocation6], 2080   ;;  %p1547_p12 = pmov %p1546_p4 }
  0x55   : > { %p1548_p13 = pmov %p1546_p4 }
  0x56   : > { %1230 = vsyncadd (%p1547_p12), [#allocation6], 4294965216 }
  0x57   : > { %1232 = dma.done.wait (%p1548_p13), [#allocation9], 2048   ;;  %p1549_p2 = pmov %p1546_p4 }
  0x58   : > { %v843_v0 = vld [vmem:[#allocation5 + $0x70] sm:$0xf]  ;;  %v938_v1 = vld [vmem:[#allocation5 + $0x74] sm:$0xf0]  ;;  %v937_v2 = vld [vmem:[#allocation5 + $0x74] sm:$0xf] }
  0x59   : > { %1234 = vsyncadd (%p1549_p2), [#allocation9], 4294965248  ;;  %v844_v3 = vor.u32 %v938_v1, %v843_v0  ;;  %v845_v4 = vld [vmem:[#allocation5 + $0x78] sm:$0xf0]  ;;  %v835_v5 = vld [vmem:[#allocation5 + $0x60] sm:$0xf] }
  0x5a   : > { %v936_v6 = vld [vmem:[#allocation5 + $0x64] sm:$0xf0]  ;;  %v848_v7 = vor.u32 %v937_v2, %v845_v4  ;;  %v935_v8 = vld [vmem:[#allocation5 + $0x64] sm:$0xf]  ;;  %v837_v9 = vld [vmem:[#allocation5 + $0x68] sm:$0xf0] }
  0x5b   : > { %415 = vmatpush.bf16.msra.mxu0 %v844_v3  ;;  %v836_v10 = vor.u32 %v936_v6, %v835_v5  ;;  %v840_v11 = vor.u32 %v935_v8, %v837_v9  ;;  %v827_v12 = vld [vmem:[#allocation5 + $0x50] sm:$0xf]  ;;  %v934_v13 = vld [vmem:[#allocation5 + $0x54] sm:$0xf0]  ;;  %v933_v14 = vld [vmem:[#allocation5 + $0x54] sm:$0xf] }
  0x5c   : > { %429 = vmatpush.bf16.msra.mxu1 %v848_v7  ;;  %v829_v15 = vld [vmem:[#allocation5 + $0x58] sm:$0xf0]  ;;  %v828_v16 = vor.u32 %v934_v13, %v827_v12  ;;  %v819_v18 = vld [vmem:[#allocation5 + $0x40] sm:$0xf]  ;;  %v932_v19 = vld [vmem:[#allocation5 + $0x44] sm:$0xf0] }
  0x5d   : > { %v832_v17 = vor.u32 %v933_v14, %v829_v15  ;;  %v931_v20 = vld [vmem:[#allocation5 + $0x44] sm:$0xf]  ;;  %v821_v21 = vld [vmem:[#allocation5 + $0x48] sm:$0xf0]  ;;  %v820_v22 = vor.u32 %v932_v19, %v819_v18  ;;  %v946_v23 = vld [vmem:[#allocation8 + $0x38] sm:$0xff]  ;;  %s299_s17 = scalar_lea.vmem [#allocation10], %s780_s25 }
  0x5e   : > { %v954_v24 = vld [vmem:[#allocation8 + $0x78] sm:$0xff]  ;;  %v824_v25 = vor.u32 %v931_v20, %v821_v21  ;;  %v811_v26 = vld [vmem:[#allocation5 + $0x30] sm:$0xf]  ;;  %v929_v28 = vld [vmem:[#allocation5 + $0x34] sm:$0xf]  ;;  %581 = vmatpush.bf16.msra.mxu2 %v946_v23  ;;  %s642_s23 = scalar_lea.sflag [#allocation4], %s1438_s16 }
  0x5f   : > { %416 = vmatpush.bf16.msra.mxu0 %v836_v10  ;;  %v930_v27 = vld [vmem:[#allocation5 + $0x34] sm:$0xf0]  ;;  %v813_v29 = vld [vmem:[#allocation5 + $0x38] sm:$0xf0]  ;;  %595 = vmatpush.bf16.msra.mxu3 %v954_v24  ;;  %v803_v34 = vld [vmem:[#allocation5 + $0x20] sm:$0xf] }
  0x60   : > { %430 = vmatpush.bf16.msra.mxu1 %v840_v11  ;;  %v945_v30 = vld [vmem:[#allocation8 + $0x30] sm:$0xff]  ;;  %v812_v32 = vor.u32 %v930_v27, %v811_v26  ;;  %v816_v33 = vor.u32 %v929_v28, %v813_v29  ;;  %v928_v35 = vld [vmem:[#allocation5 + $0x24] sm:$0xf0]  ;;  %v927_v36 = vld [vmem:[#allocation5 + $0x24] sm:$0xf]  ;;  %s914_s28 = sshll.u32 (%p1350_p11), %s1319_s22, 1 }
  0x61   : > { %v953_v31 = vld [vmem:[#allocation8 + $0x70] sm:$0xff]  ;;  %v805_v37 = vld [vmem:[#allocation5 + $0x28] sm:$0xf0]  ;;  %v804_v40 = vor.u32 %v928_v35, %v803_v34  ;;  %v797_v45 = vld [vmem:[#allocation5 + $0x18] sm:$0xf0]  ;;  %s650_s14 = ssub.s32 (%p1350_p11), 3, %s914_s28 }
  0x62   : > { %582 = vmatpush.bf16.msra.mxu2 %v945_v30  ;;  %v944_v38 = vld [vmem:[#allocation8 + $0x28] sm:$0xff]  ;;  %v808_v41 = vor.u32 %v927_v36, %v805_v37  ;;  %v926_v43 = vld [vmem:[#allocation5 + $0x14] sm:$0xf0]  ;;  %v925_v44 = vld [vmem:[#allocation5 + $0x14] sm:$0xf]  ;;  %p651_p6 = scmp.lt.s32.totalorder (%p1350_p11), %s650_s14, 2 }
  0x63   : > { %417 = vmatpush.bf16.msra.mxu0 %v828_v16  ;;  %596 = vmatpush.bf16.msra.mxu3 %v953_v31  ;;  %v952_v39 = vld [vmem:[#allocation8 + $0x68] sm:$0xff]  ;;  %v943_v46 = vld [vmem:[#allocation8 + $0x20] sm:$0xff]  ;;  %v800_v49 = vor.u32 %v925_v44, %v797_v45  ;;  %v942_v59 = vld [vmem:[#allocation8 + $0x18] sm:$0xff] }
  0x64   : > { %431 = vmatpush.bf16.msra.mxu1 %v832_v17  ;;  %v795_v42 = vld [vmem:[#allocation5 + $0x10] sm:$0xf]  ;;  %v951_v47 = vld [vmem:[#allocation8 + $0x60] sm:$0xff]  ;;  %v789_v53 = vld [vmem:[#allocation5 + $0x8] sm:$0xf0] }
  0x65   : > { %v796_v48 = vor.u32 %v926_v43, %v795_v42  ;;  %v787_v50 = vld [vmem:[#allocation5] sm:$0xf]  ;;  %v924_v51 = vld [vmem:[#allocation5 + $0x4] sm:$0xf0]  ;;  %v923_v52 = vld [vmem:[#allocation5 + $0x4] sm:$0xf] }
  0x66   : > { %583 = vmatpush.bf16.msra.mxu2 %v944_v38  ;;  %v788_v54 = vor.u32 %v924_v51, %v787_v50  ;;  %v310_v55 = vld [vmem:[%s1444_s8] sm:$0xff]  ;;  %v311_v56 = vld [vmem:[%s1444_s8 + $0x8] sm:$0xff]  ;;  %v792_v57 = vor.u32 %v923_v52, %v789_v53 }
  0x67   : > { %418 = vmatpush.bf16.msra.mxu0 %v820_v22  ;;  %597 = vmatpush.bf16.msra.mxu3 %v952_v39  ;;  %v312_v58 = vpack.c.bf16 %v311_v56, %v310_v55  ;;  %v950_v60 = vld [vmem:[#allocation8 + $0x58] sm:$0xff]  ;;  %v941_v61 = vld [vmem:[#allocation8 + $0x10] sm:$0xff]  ;;  %v940_v63 = vld [vmem:[#allocation8 + $0x8] sm:$0xff] }
  0x68   : > { %432 = vmatpush.bf16.msra.mxu1 %v824_v25  ;;  %v949_v62 = vld [vmem:[#allocation8 + $0x50] sm:$0xff]  ;;  %v948_v0 = vld [vmem:[#allocation8 + $0x48] sm:$0xff]  ;;  %v939_v1 = vld [vmem:[#allocation8] sm:$0xff] }
  0x69   : > { %v947_v2 = vld [vmem:[#allocation8 + $0x40] sm:$0xff]  ;;  %v329_v3 = vld [vmem:[#allocation7] sm:$0x3] }
  0x6a   : > { %584 = vmatpush.bf16.msra.mxu2 %v943_v46  ;;  %v331_v6 = vperm.slane %v329_v3, 0  ;;  %v332_v7 = vperm.slane %v329_v3, 1  ;;  %v1034_v20 = vld [vmem:[%s1531_s4] ss:$0 sm:$0xff] }
  0x6b   : > { %419 = vmatpush.bf16.msra.mxu0 %v812_v32  ;;  %598 = vmatpush.bf16.msra.mxu3 %v951_v47 }
  0x6c   : > { %433 = vmatpush.bf16.msra.mxu1 %v816_v33 }
  0x6e   : > { %585 = vmatpush.bf16.msra.mxu2 %v942_v59 }
  0x6f   : > { %420 = vmatpush.bf16.msra.mxu0 %v804_v40  ;;  %599 = vmatpush.bf16.msra.mxu3 %v950_v60 }
  0x70   : > { %434 = vmatpush.bf16.msra.mxu1 %v808_v41 }
  0x72   : > { %586 = vmatpush.bf16.msra.mxu2 %v941_v61 }
  0x73   : > { %421 = vmatpush.bf16.msra.mxu0 %v796_v48  ;;  %600 = vmatpush.bf16.msra.mxu3 %v949_v62 }
  0x74   : > { %435 = vmatpush.bf16.msra.mxu1 %v800_v49 }
  0x76   : > { %587 = vmatpush.bf16.msra.mxu2 %v940_v63 }
  0x77   : > { %422 = vmatpush.bf16.msra.mxu0 %v788_v54  ;;  %601 = vmatpush.bf16.msra.mxu3 %v948_v0 }
  0x78   : > { %436 = vmatpush.bf16.msra.mxu1 %v792_v57 }
  0x7a   : > { %423 = vmatmul.bf16.vlgmr.msra.gmra.mxu0 %v312_v58  ;;  %588 = vmatpush.bf16.msra.mxu2 %v939_v1 }
  0x7b   : > { %437 = vmatmul.bf16.vlgmr.msra.gmra.mxu1 %v312_v58  ;;  %602 = vmatpush.bf16.msra.mxu3 %v947_v2 }
  0xf7   : > { %v424_v4 = vpop.f32.mrf.mxu0 }
  0xf8   : > { %v438_v5 = vpop.f32.mrf.mxu1  ;;  %v425_v8 = vadd.f32 %v424_v4, %v331_v6 }
  0xf9   : > { %v439_v9 = vadd.f32 %v438_v5, %v332_v7 }
  0xfa   : > { %v443_v14 = vmax.f32 %v425_v8, 0.0 }
  0xfb   : > { %v444_v16 = vmax.f32 %v439_v9, 0.0 }
  0xff   : > { %v426_v10 = vpop.f32.mrf.mxu0 }
 0x100   : > { %v427_v11 = vadd.f32 %v426_v10, %v331_v6  ;;  %v440_v12 = vpop.f32.mrf.mxu1 }
 0x101   : > { %v441_v13 = vadd.f32 %v440_v12, %v332_v7 }
 0x102   : > { %v445_v15 = vmax.f32 %v427_v11, 0.0 }
 0x103   : > { %v446_v17 = vmax.f32 %v441_v13, 0.0 }
 0x104   : > { %v447_v18 = vpack.c.bf16 %v445_v15, %v443_v14 }
 0x105   : > { %v448_v19 = vpack.c.bf16 %v446_v17, %v444_v16 }
 0x106   : > { %589 = vmatmul.bf16.vlgmr.msra.gmra.mxu2 %v447_v18 }
 0x107   : > { %603 = vmatmul.bf16.vlgmr.msra.gmra.mxu3 %v448_v19 }
 0x189   : > { %v590_v21 = vpop.f32.mrf.mxu2 }
 0x18a   : > { %v591_v22 = vadd.f32 %v1034_v20, %v590_v21  ;;  %v604_v23 = vpop.f32.mrf.mxu3 }
 0x18c   : > { %v605_v24 = vadd.f32 %v604_v23, %v591_v22 }
 0x18e   : > { %v609_v25 = vmul.f32 %v605_v24, %v605_v24 }
 0x190   : > { %611 = vadd.xlane.f32.xlu0 %v609_v25 }
 0x191   : > { %v592_v26 = vpop.f32.mrf.mxu2 }
 0x192   : > { %v593_v27 = vadd.f32 %v1034_v20, %v592_v26  ;;  %v606_v28 = vpop.f32.mrf.mxu3 }
 0x194   : > { %v607_v29 = vadd.f32 %v606_v28, %v593_v27 }
 0x196   : > { %v610_v30 = vmul.f32 %v607_v29, %v607_v29 }
 0x198   : > { %613 = vadd.xlane.f32.xlu0 %v610_v30 }
 0x203   : > { %v612_v31 = vpop.xlane.xlu0 %611 }
 0x204   : > { %v615_v32 = vmax.f32 %v612_v31, 1e-24 }
 0x206   : > { %1035 = vrsqrt.f32 %v615_v32  ;;  %vm623_vm1 = vweird.f32 %v615_v32 }
 0x20b   : > { %v614_v33 = vpop.xlane.xlu0 %613 }
 0x20c   : > { %v1036_v34 = vpop.eup %1035  ;;  %v616_v35 = vmax.f32 %v614_v33, 1e-24 }
 0x20d   : > { %v618_v36 = vmul.f32 %v1036_v34, %v615_v32  ;;  %vm624_vm0 = vweird.f32 %v1036_v34 }
 0x20e   : > { %1037 = vrsqrt.f32 %v616_v35  ;;  %vm625_vm2 = vmor %vm623_vm1, %vm624_vm0  ;;  %vm633_vm4 = vweird.f32 %v616_v35 }
 0x20f   : > { %v619_v37 = vmul.f32 %v1036_v34, %v618_v36 }
 0x211   : > { %v620_v38 = vmul.f32 0.5, %v619_v37 }
 0x213   : > { %v621_v39 = vsub.f32 1.5, %v620_v38 }
 0x214   : > { %v1038_v40 = vpop.eup %1037 }
 0x215   : > { %v622_v41 = vmul.f32 %v1036_v34, %v621_v39  ;;  %v628_v42 = vmul.f32 %v1038_v40, %v616_v35  ;;  %vm634_vm3 = vweird.f32 %v1038_v40 }
 0x216   : > { %vm635_vm5 = vmor %vm633_vm4, %vm634_vm3 }
 0x217   : > { %v626_v43 = vsel %vm625_vm2, %v1036_v34, %v622_v41  ;;  %v629_v44 = vmul.f32 %v1038_v40, %v628_v42 }
 0x218   : > { %v637_v45 = vmul.f32 %v626_v43, %v605_v24 }
 0x219   : > { %v630_v46 = vmul.f32 0.5, %v629_v44 }
 0x21a   : > { %639 = vst [vmem:[%s299_s17] sm:$0xff] %v637_v45 }
 0x21b   : > { %v631_v47 = vsub.f32 1.5, %v630_v46 }
 0x21d   : > { %v632_v48 = vmul.f32 %v1038_v40, %v631_v47 }
 0x21e   : > { %648 = sbr.rel (!%p1350_p11) target bundleno = 578 (0x242), region = 60 }
 0x21f   : > { %v636_v49 = vsel %vm635_vm5, %v1038_v40, %v632_v48 }
 0x220   : > { %v638_v50 = vmul.f32 %v636_v49, %v607_v29 }
 0x222   : > { %640 = vst [vmem:[%s299_s17 + $0x8] sm:$0xff] %v638_v50 }
 0x223   : > { %s1560_s14 = smov (!%p651_p6, %s650_s14), 2 }
 0x224   : > { %s915_s15 = sshll.u32 %s1560_s14, 3 }
 0x225   : > { %s654_s10 = ssub.s32 16, %s915_s15 }
 0x226   : > { %s655_s9 = sshll.u32 %s654_s10, 4 }
 0x227   : > { %656 = vsyncadd %s642_s23, %s655_s9  ;;  %p1474_p5 = scmp.ne.s32.totalorder %s915_s15, 0  ;;  %s955_s30 = sshll.u32 %s1319_s22, 4 }
 0x228   : > { %s659_s12 = scalar_lea.hbm %s1532_s5, %s955_s30  ;;  %s661_s13 = sshll.u32 %s299_s17, 4  ;;  %s1482_s13 = int_to_ptr.vmem [resolvable:$true] %s661_s13 }
 0x229   : > { %s663_s25 = sshll.u32 %s659_s12, 4  ;;  %s919_s26 = sshll.u32 %s1560_s14, 7  ;;  %s1484_s25 = int_to_ptr.hbm [resolvable:$true] %s663_s25 }
 0x22a   : > { %s1168_s8 = sshra.s32 %s1482_s13, 4  ;;  %s1170_s29 = sshrl.u32 %s919_s26, 4  ;;  %s1169_s8 = int_to_ptr.vmem [resolvable:$true] %s1168_s8 }
 0x22b   : > { %s1175_s7 = scalar_lea.vmem %s1169_s8, %s1170_s29  ;;  %s1265_s22 = smov [#allocation10]  }
 0x22c   : > { %p1176_p11 = scmp.ne.s32.totalorder %s1169_s8, %s1175_s7  ;;  %s1179_s28 = scalar_lea.vmem %s1265_s22, 32 }
 0x22d   : > { %p1181_p1 = scmp.lt.s32.totalorder %s1179_s28, %s1175_s7 }
 0x22e   : > { %p1177_p9 = pnand %p1176_p11, %p1474_p5 }
 0x230   : > { %p1178_p10 = pneg %p1177_p9 }
 0x232   : > { %p1183_p0 = pnand %p1181_p1, %p1178_p10 }
 0x234   : > { %1186 = shalt.err (!%p1183_p0)
}
 0x235   : > { %s1187_s17 = sshra.s32 %s1484_s25, 4  ;;  %s1198_s30 = scalar_lea.hbm %s1532_s5, 24  ;;  %s1188_s17 = int_to_ptr.hbm [resolvable:$true] %s1187_s17 }
 0x236   : > { %s1194_s15 = scalar_lea.hbm %s1188_s17, %s1170_s29  ;;  %p1199_p4 = scmp.lt.s32.totalorder %s1188_s17, %s1532_s5 }
 0x237   : > { %p1195_p3 = scmp.ne.s32.totalorder %s1188_s17, %s1194_s15  ;;  %p1200_p12 = scmp.lt.s32.totalorder %s1198_s30, %s1194_s15 }
 0x239   : > { %p1196_p7 = pnand %p1195_p3, %p1474_p5  ;;  %p1201_p13 = por %p1200_p12, %p1199_p4 }
 0x23b   : > { %p1197_p8 = pneg %p1196_p7 }
 0x23d   : > { %p1202_p2 = pnand %p1201_p13, %p1197_p8 }
 0x23f   : > { %1205 = shalt.err (!%p1202_p2)
}
 0x240   : > { %s1266_s12 = smov 128   ;;  %s1267_s8 = smov 8  }
 0x241   : > { %669 = dma.vmem_to_hbm [thread:$0]  (%p1474_p5), %s1482_s13, %s919_s26, %s1484_s25, %s642_s23, %s1266_s12, %s1266_s12, %s1267_s8  }
 0x242 PF: > { %s678_s29 = sand.u32 1, %s1241_s18   ;;  %p1551_p6 = scmp.ne.s32.totalorder %s1540_s6, 0 }
 0x243   : > { %p1552_p11 = scmp.ge.s32.totalorder %s1253_s21, 2  ;;  %s679_s7 = scalar_lea.sflag [#allocation4], %s678_s29 }
 0x245   : > { %p981_p9 = pnand %p1552_p11, %p1551_p6 }
 0x247   : > { %p982_p10 = pneg %p981_p9 }
 0x249   : > { %1236 = dma.done.wait (%p982_p10), %s679_s7, 256  }
 0x24a   : > { %1238 = vsyncadd (%p982_p10), %s679_s7, 4294967040  ;;  %p20_p1 = scmp.ge.s32.totalorder %s1323_s24, 4   ;;  %s1553_s18 = smov %s1245_s19 }
 0x24b   : > { %s1554_s19 = smov %s1249_s20  ;;  %s1555_s20 = smov %s1335_s27 }
 0x24c   : > { %s1556_s21 = smov %s1323_s24  ;;  %22 = sbr.rel (!%p20_p1) target bundleno = 10 (0xa), region = 97 }
 0x251   :  { %685 = vsyncpa [#allocation3], 1 }
 0x252   :  { %687 = vsyncpa [#allocation3 + $0x1], 1 }
 0x253   :  { %688 = vsyncpa [#allocation6], 1 }
 0x254   :  { %689 = vsyncpa [#allocation9], 1 }
 0x255   :  { %690 = vsyncpa [#allocation4], 1 }
 0x256   :  { %692 = vsyncpa [#allocation4 + $0x1], 1 }

</bundles_post_ra>
